<compile_context>
chip_gen: v6e
topology: v6e:2x2x1
jax: 0.10.0
libtpu: 0.0.40
codegen_flags: <defaults>
</compile_context>

<pallas_src>
import math
import jax
import jax.numpy as jnp
from jax.experimental import pallas as pl
from jax.experimental.pallas import tpu as pltpu


def make_attention_kernel(num_heads, head_dim, compute_dtype):
    H, d = num_heads, head_dim
    scale = head_dim ** (-0.5)

    def kernel(x_ref, wqkv_ref, bqkv_ref, wo_ref, bo_ref, o_ref):
        x = x_ref[0]                                   # (S, E), compute_dtype
        S = x.shape[0]
        E = H * d

        # ---- fused, head-major QKV projection: one batched MXU einsum ----
        # (H, S, E) x (H, E, 3d) -> (H, S, 3d), f32 accumulation
        xb = jnp.broadcast_to(x, (H, S, E))
        qkv = jnp.einsum("hse,hef->hsf", xb, wqkv_ref[...],
                         preferred_element_type=jnp.float32)
        qkv = qkv + bqkv_ref[...]                      # (H, 1, 3d) broadcasts over S

        q = (qkv[:, :, 0:d] * scale).astype(compute_dtype)   # scale folded into Q
        k = qkv[:, :, d:2 * d].astype(compute_dtype)
        v = qkv[:, :, 2 * d:3 * d].astype(compute_dtype)

        # ---- scaled dot-product attention, batched over heads ----
        # trans-B contraction: no materialized K transpose.
        s = jnp.einsum("hqd,hkd->hqk", q, k,
                       preferred_element_type=jnp.float32)   # (H, S, S) f32
        m = jnp.max(s, axis=-1, keepdims=True)
        p = jnp.exp(s - m)
        p = p * pl.reciprocal(jnp.sum(p, axis=-1, keepdims=True), approx=True)
        out = jnp.einsum("hqk,hkd->hqd", p.astype(compute_dtype), v,
                         preferred_element_type=jnp.float32)  # (H, S, d)

        # ---- output projection, distributed over heads (no concat) ----
        yh = jnp.einsum("hsd,hde->hse", out.astype(compute_dtype), wo_ref[...],
                        preferred_element_type=jnp.float32)   # (H, S, E)
        y = jnp.sum(yh, axis=0) + bo_ref[...]                 # (S, E)
        o_ref[0] = y.astype(o_ref.dtype)

    return kernel


def pack_params(params, num_heads):
    """Host-side (free, one-time) re-layout of the weights into the fused,
    head-major tensors the kernel consumes."""
    wq, wk, wv, wo = params["wq"], params["wk"], params["wv"], params["wo"]
    bq, bk, bv, bo = params["bq"], params["bk"], params["bv"], params["bo"]
    E = wq.shape[0]
    H = num_heads
    d = E // H

    def w_heads(w):   # (E, E) -> (H, E, d)
        return jnp.transpose(w.reshape(E, H, d), (1, 0, 2))

    def b_heads(b):   # (1, E) -> (H, 1, d)
        return b.reshape(H, d)[:, None, :]

    w_qkv = jnp.concatenate([w_heads(wq), w_heads(wk), w_heads(wv)], axis=-1)  # (H, E, 3d)
    b_qkv = jnp.concatenate([b_heads(bq), b_heads(bk), b_heads(bv)], axis=-1)  # (H, 1, 3d)
    wo_h = wo.reshape(H, d, E)                                                  # (H, d, E)
    return w_qkv, b_qkv, wo_h, bo


def attention_pallas(x, params, num_heads, compute_dtype=jnp.float32):
    """x: (B, S, E) float32.  compute_dtype=bf16 recommended on v6e/v7x
    (matmul inputs only; accumulation, softmax and biases stay f32)."""
    B, S, E = x.shape
    assert E % num_heads == 0
    H = num_heads
    d = E // H

    w_qkv, b_qkv, wo_h, bo = pack_params(params, num_heads)
    x_c = x.astype(compute_dtype)
    w_qkv = w_qkv.astype(compute_dtype)
    wo_h = wo_h.astype(compute_dtype)

    kernel = make_attention_kernel(H, d, compute_dtype)

    full = lambda shape: pl.BlockSpec(shape, lambda b, _s=shape: (0,) * len(_s))

    return pl.pallas_call(
        kernel,
        out_shape=jax.ShapeDtypeStruct((B, S, E), x.dtype),
        grid_spec=pltpu.PrefetchScalarGridSpec(
            num_scalar_prefetch=0,
            grid=(B,),                                       # parallel over batch
            in_specs=[
                pl.BlockSpec((1, S, E), lambda b: (b, 0, 0)),   # x
                full((H, E, 3 * d)),                            # fused QKV weight
                full((H, 1, 3 * d)),                            # fused QKV bias (f32)
                full((H, d, E)),                                # out-proj weight
                full((1, E)),                                   # out-proj bias (f32)
            ],
            out_specs=pl.BlockSpec((1, S, E), lambda b: (b, 0, 0)),
        ),
        compiler_params=pltpu.CompilerParams(
            dimension_semantics=("parallel",)),
    )(x_c, w_qkv, b_qkv, wo_h, bo)


def attention_reference(x, params, num_heads):
    """Pure-JAX reference mirroring the PyTorch forward."""
    B, S, E = x.shape
    d = E // num_heads
    scale = d ** (-0.5)
    q = x @ params["wq"] + params["bq"]
    k = x @ params["wk"] + params["bk"]
    v = x @ params["wv"] + params["bv"]

    def split(t):  # b s (h d) -> (b h) s d
        return t.reshape(B, S, num_heads, d).transpose(0, 2, 1, 3).reshape(B * num_heads, S, d)

    q, k, v = split(q), split(k), split(v)
    inner = jnp.einsum("bqd,bkd->bqk", q, k) * scale
    attn = jax.nn.softmax(inner, axis=-1)
    out = jnp.einsum("bqk,bkd->bqd", attn, v)
    out = out.reshape(B, num_heads, S, d).transpose(0, 2, 1, 3).reshape(B, S, E)
    return out @ params["wo"] + params["bo"]


if __name__ == "__main__":
    B, S, E, H = 2, 8, 32, 4

    key = jax.random.PRNGKey(0)
    keys = jax.random.split(key, 9)
    bound = 1.0 / math.sqrt(E)   # nn.Linear default init range

    def lin(kw, kb):
        # stored as [E_in, E_out] (already "transposed" vs. torch's [out, in])
        w = jax.random.uniform(kw, (E, E), jnp.float32, -bound, bound)
        b = jax.random.uniform(kb, (1, E), jnp.float32, -bound, bound)
        return w, b

    wq, bq = lin(keys[0], keys[1])
    wk, bk = lin(keys[2], keys[3])
    wv, bv = lin(keys[4], keys[5])
    wo, bo = lin(keys[6], keys[7])
    params = dict(wq=wq, bq=bq, wk=wk, bk=bk, wv=wv, bv=bv, wo=wo, bo=bo)

    x = jax.random.normal(keys[8], (B, S, E), jnp.float32)

    ref = attention_reference(x, params, H)

    # f32-compute path (tight check)
    out = attention_pallas(x, params, H, compute_dtype=jnp.float32)
    jax.block_until_ready(out)
    assert out.shape == (B, S, E)
    assert jnp.allclose(out, ref, atol=1e-2, rtol=1e-2), "f32 path mismatch vs reference"

    # bf16 matmul-input path (v6e/v7x MXU peak); loose check for reduced precision.
    out_bf16 = attention_pallas(x, params, H, compute_dtype=jnp.bfloat16)
    jax.block_until_ready(out_bf16)
    assert out_bf16.shape == (B, S, E)
    assert jnp.allclose(out_bf16, ref, atol=5e-2, rtol=5e-2), "bf16 path mismatch vs reference"

    print("KERNEL_OK")
</pallas_src>

<mosaic_0001>
module attributes {stable_mosaic.version = 11 : i64} {
  func.func @kernel(%arg0: i32, %arg1: memref<1x8x32xf32, #tpu.memory_space<vmem>>, %arg2: memref<4x32x24xf32, #tpu.memory_space<vmem>>, %arg3: memref<4x1x24xf32, #tpu.memory_space<vmem>>, %arg4: memref<4x8x32xf32, #tpu.memory_space<vmem>>, %arg5: memref<1x32xf32, #tpu.memory_space<vmem>>, %arg6: memref<1x8x32xf32, #tpu.memory_space<vmem>>) attributes {dimension_semantics = [#tpu.dimension_semantics<parallel>], iteration_bounds = array<i64: 2>, scalar_prefetch = 0 : i64, scratch_operands = 0 : i64, tpu.core_type = #tpu.core_type<tc>, window_params = [{transform_indices = @transform_0, window_bounds = array<i64: 1, 8, 32>}, {pipeline_mode = #tpu.pipeline_mode<synchronous>, transform_indices = @transform_1, window_bounds = array<i64: 4, 32, 24>}, {pipeline_mode = #tpu.pipeline_mode<synchronous>, transform_indices = @transform_2, window_bounds = array<i64: 4, 1, 24>}, {pipeline_mode = #tpu.pipeline_mode<synchronous>, transform_indices = @transform_3, window_bounds = array<i64: 4, 8, 32>}, {pipeline_mode = #tpu.pipeline_mode<synchronous>, transform_indices = @transform_4, window_bounds = array<i64: 1, 32>}, {transform_indices = @transform_5, window_bounds = array<i64: 1, 8, 32>}]} {
    %c0 = arith.constant 0 : index
    %c0_0 = arith.constant 0 : index
    %c0_1 = arith.constant 0 : index
    %0 = vector.load %arg1[%c0, %c0_0, %c0_1] : memref<1x8x32xf32, #tpu.memory_space<vmem>>, vector<1x8x32xf32>
    %1 = vector.shape_cast %0 : vector<1x8x32xf32> to vector<8x32xf32>
    %2 = vector.shape_cast %1 : vector<8x32xf32> to vector<1x8x32xf32>
    %3 = vector.broadcast %2 : vector<1x8x32xf32> to vector<4x8x32xf32>
    %c0_2 = arith.constant 0 : index
    %c0_3 = arith.constant 0 : index
    %c0_4 = arith.constant 0 : index
    %4 = vector.load %arg2[%c0_2, %c0_3, %c0_4] : memref<4x32x24xf32, #tpu.memory_space<vmem>>, vector<4x32x24xf32>
    "tpu.trace_start"() <{level = 10 : i32, message = "hse,hef->hsf"}> : () -> ()
    %cst = arith.constant dense<0.000000e+00> : vector<4x8x24xf32>
    %5 = tpu.matmul %3, %4, %cst {dimension_numbers = #tpu.dot_dimension_numbers<[2], [1], [1], [2], [0, 0, 0, 1, 1, 2], [0], [0]>} : vector<4x8x32xf32>, vector<4x32x24xf32>, vector<4x8x24xf32> -> vector<4x8x24xf32>
    "tpu.trace_stop"() : () -> ()
    %c0_5 = arith.constant 0 : index
    %c0_6 = arith.constant 0 : index
    %c0_7 = arith.constant 0 : index
    %6 = vector.load %arg3[%c0_5, %c0_6, %c0_7] : memref<4x1x24xf32, #tpu.memory_space<vmem>>, vector<4x1x24xf32>
    %7 = vector.broadcast %6 : vector<4x1x24xf32> to vector<4x8x24xf32>
    %8 = arith.addf %5, %7 : vector<4x8x24xf32>
    %9 = vector.extract_strided_slice %8 {offsets = [0, 0, 0], sizes = [4, 8, 8], strides = [1, 1, 1]} : vector<4x8x24xf32> to vector<4x8x8xf32>
    %cst_8 = arith.constant 0.353553385 : f32
    %10 = vector.broadcast %cst_8 : f32 to vector<4x8x8xf32>
    %11 = arith.mulf %9, %10 : vector<4x8x8xf32>
    %12 = vector.extract_strided_slice %8 {offsets = [0, 0, 8], sizes = [4, 8, 8], strides = [1, 1, 1]} : vector<4x8x24xf32> to vector<4x8x8xf32>
    %13 = vector.extract_strided_slice %8 {offsets = [0, 0, 16], sizes = [4, 8, 8], strides = [1, 1, 1]} : vector<4x8x24xf32> to vector<4x8x8xf32>
    "tpu.trace_start"() <{level = 10 : i32, message = "hqd,hkd->hqk"}> : () -> ()
    %cst_9 = arith.constant dense<0.000000e+00> : vector<4x8x8xf32>
    %14 = tpu.matmul %11, %12, %cst_9 {dimension_numbers = #tpu.dot_dimension_numbers<[2], [2], [1], [1], [0, 0, 0, 1, 1, 1], [0], [0]>} : vector<4x8x8xf32>, vector<4x8x8xf32>, vector<4x8x8xf32> -> vector<4x8x8xf32>
    "tpu.trace_stop"() : () -> ()
    %cst_10 = arith.constant dense<0xFF800000> : vector<4x8xf32>
    %15 = vector.multi_reduction <maximumf>, %14, %cst_10 [2] : vector<4x8x8xf32> to vector<4x8xf32>
    %16 = vector.shape_cast %15 : vector<4x8xf32> to vector<4x8x1xf32>
    %17 = vector.broadcast %16 : vector<4x8x1xf32> to vector<4x8x8xf32>
    %18 = arith.subf %14, %17 : vector<4x8x8xf32>
    %19 = math.exp %18 : vector<4x8x8xf32>
    %cst_11 = arith.constant dense<0.000000e+00> : vector<4x8xf32>
    %20 = vector.multi_reduction <add>, %19, %cst_11 [2] : vector<4x8x8xf32> to vector<4x8xf32>
    %21 = vector.shape_cast %20 : vector<4x8xf32> to vector<4x8x1xf32>
    %22 = tpu.reciprocal %21 {approx = true} : vector<4x8x1xf32> -> vector<4x8x1xf32>
    %23 = vector.broadcast %22 : vector<4x8x1xf32> to vector<4x8x8xf32>
    %24 = arith.mulf %19, %23 : vector<4x8x8xf32>
    "tpu.trace_start"() <{level = 10 : i32, message = "hqk,hkd->hqd"}> : () -> ()
    %cst_12 = arith.constant dense<0.000000e+00> : vector<4x8x8xf32>
    %25 = tpu.matmul %24, %13, %cst_12 {dimension_numbers = #tpu.dot_dimension_numbers<[2], [1], [1], [2], [0, 0, 0, 1, 1, 2], [0], [0]>} : vector<4x8x8xf32>, vector<4x8x8xf32>, vector<4x8x8xf32> -> vector<4x8x8xf32>
    "tpu.trace_stop"() : () -> ()
    %c0_13 = arith.constant 0 : index
    %c0_14 = arith.constant 0 : index
    %c0_15 = arith.constant 0 : index
    %26 = vector.load %arg4[%c0_13, %c0_14, %c0_15] : memref<4x8x32xf32, #tpu.memory_space<vmem>>, vector<4x8x32xf32>
    "tpu.trace_start"() <{level = 10 : i32, message = "hsd,hde->hse"}> : () -> ()
    %cst_16 = arith.constant dense<0.000000e+00> : vector<4x8x32xf32>
    %27 = tpu.matmul %25, %26, %cst_16 {dimension_numbers = #tpu.dot_dimension_numbers<[2], [1], [1], [2], [0, 0, 0, 1, 1, 2], [0], [0]>} : vector<4x8x8xf32>, vector<4x8x32xf32>, vector<4x8x32xf32> -> vector<4x8x32xf32>
    "tpu.trace_stop"() : () -> ()
    %cst_17 = arith.constant dense<0.000000e+00> : vector<8x32xf32>
    %28 = vector.multi_reduction <add>, %27, %cst_17 [0] : vector<4x8x32xf32> to vector<8x32xf32>
    %c0_18 = arith.constant 0 : index
    %c0_19 = arith.constant 0 : index
    %29 = vector.load %arg5[%c0_18, %c0_19] : memref<1x32xf32, #tpu.memory_space<vmem>>, vector<1x32xf32>
    %30 = vector.broadcast %29 : vector<1x32xf32> to vector<8x32xf32>
    %31 = arith.addf %28, %30 : vector<8x32xf32>
    %c0_20 = arith.constant 0 : index
    %c0_21 = arith.constant 0 : index
    %c0_22 = arith.constant 0 : index
    %32 = vector.load %arg6[%c0_20, %c0_21, %c0_22] : memref<1x8x32xf32, #tpu.memory_space<vmem>>, vector<1x8x32xf32>
    %33 = vector.shape_cast %32 : vector<1x8x32xf32> to vector<8x32xf32>
    %34 = vector.shape_cast %31 : vector<8x32xf32> to vector<1x8x32xf32>
    tpu.vector_store %arg6[%c0_20, %c0_21, %c0_22], %34 {strides = array<i32>} : memref<1x8x32xf32, #tpu.memory_space<vmem>>, vector<1x8x32xf32>,
    return
  }
  func.func @transform_0(%arg0: i32) -> (i32, i32, i32) {
    %c0_i32 = arith.constant 0 : i32
    %c0_i32_0 = arith.constant 0 : i32
    %c0_i32_1 = arith.constant 0 : i32
    return %arg0, %c0_i32, %c0_i32_0 : i32, i32, i32
  }
  func.func @transform_1(%arg0: i32) -> (i32, i32, i32) {
    %c0_i32 = arith.constant 0 : i32
    %c0_i32_0 = arith.constant 0 : i32
    %c0_i32_1 = arith.constant 0 : i32
    %c0_i32_2 = arith.constant 0 : i32
    return %c0_i32, %c0_i32_0, %c0_i32_1 : i32, i32, i32
  }
  func.func @transform_2(%arg0: i32) -> (i32, i32, i32) {
    %c0_i32 = arith.constant 0 : i32
    %c0_i32_0 = arith.constant 0 : i32
    %c0_i32_1 = arith.constant 0 : i32
    %c0_i32_2 = arith.constant 0 : i32
    return %c0_i32, %c0_i32_0, %c0_i32_1 : i32, i32, i32
  }
  func.func @transform_3(%arg0: i32) -> (i32, i32, i32) {
    %c0_i32 = arith.constant 0 : i32
    %c0_i32_0 = arith.constant 0 : i32
    %c0_i32_1 = arith.constant 0 : i32
    %c0_i32_2 = arith.constant 0 : i32
    return %c0_i32, %c0_i32_0, %c0_i32_1 : i32, i32, i32
  }
  func.func @transform_4(%arg0: i32) -> (i32, i32) {
    %c0_i32 = arith.constant 0 : i32
    %c0_i32_0 = arith.constant 0 : i32
    %c0_i32_1 = arith.constant 0 : i32
    return %c0_i32, %c0_i32_0 : i32, i32
  }
  func.func @transform_5(%arg0: i32) -> (i32, i32, i32) {
    %c0_i32 = arith.constant 0 : i32
    %c0_i32_0 = arith.constant 0 : i32
    %c0_i32_1 = arith.constant 0 : i32
    return %arg0, %c0_i32, %c0_i32_0 : i32, i32, i32
  }
}

</mosaic_0001>

<bundles_post_ra>
// kernel: tpu_custom_call.1
= control target key start
LH: loop header
LB: loop body
LE: loop exit
PB: predicated region body
PF: predicated region fallthrough
CT: control target
= control target key end

     0   :  { %10 = vsyncpa [#allocation3], 0  ;;  %s2212_s0 = inlined_call_operand.vmem [shape: f32[2,8,32], index: 0, kind: input, shape index: {}]   ;;  %s2213_s1 = inlined_call_operand.vmem [shape: f32[4,32,24], index: 1, kind: input, shape index: {}]   ;;  %s2214_s2 = inlined_call_operand.vmem [shape: f32[4,1,24], index: 2, kind: input, shape index: {}]   ;;  %s2215_s3 = inlined_call_operand.vmem [shape: f32[4,8,32], index: 3, kind: input, shape index: {}]   ;;  %s2216_s4 = inlined_call_operand.vmem [shape: f32[1,32], index: 4, kind: input, shape index: {}]   ;;  %s2217_s5 = inlined_call_operand.hbm [shape: f32[2,8,32], index: 5, kind: output, shape index: {}]  }
   0x1   :  { %12 = vsyncpa [#allocation3 + $0x1], 0  ;;  %s1938_s18 = smov 0   ;;  %s1940_s19 = smov 0  }
   0x2   :  { %s1942_s20 = smov 0   ;;  %s1944_s21 = smov 0  }
   0x3 LB: > { %s1959_s22 = sadd.s32 4294967295, %s1901_s21   ;;  %s1599_s23 = sadd.s32 4294967294, %s1901_s21   ;;  %s1901_s21 = sphi %s1944_s21, %s2223_s21   ;;  %s1897_s20 = sphi %s1942_s20, %s2222_s20   ;;  %s1893_s19 = sphi %s1940_s19, %s2221_s19   ;;  %s1889_s18 = sphi %s1938_s18, %s2220_s18  }
   0x4   : > { %s1963_s24 = sadd.s32 1, %s1901_s21   ;;  %s135_s25 = sadd.s32 1, %s1897_s20 }
   0x5   : > { %s132_s26 = ssub.s32 %s1901_s21, %s1963_s24  ;;  %p145_p0 = scmp.ne.s32.totalorder %s1897_s20, %s1893_s19 }
   0x6   : > { %p133_p1 = scmp.eq.s32.totalorder %s132_s26, 0  ;;  %p146_p2 = scmp.eq.s32.totalorder %s1959_s22, 1 }
   0x7   : > { %p151_p3 = scmp.ne.s32.totalorder %s1893_s19, %s1889_s18  ;;  %p152_p4 = scmp.eq.s32.totalorder %s1599_s23, 1 }
   0x8   : > { %s1974_s27 = scalar_select %p133_p1, %s1897_s20, %s135_s25  }
   0x9   : > { %p1976_p5 = por %p146_p2, %p145_p0  ;;  %p1980_p6 = por %p152_p4, %p151_p3 }
   0xa   : > { %p1602_p7 = scmp.ge.s32.totalorder %s1901_s21, 1  ;;  %p189_p8 = scmp.lt.s32.totalorder %s1901_s21, 3 }
   0xc   : > { %p190_p9 = pnand %p1602_p7, %p189_p8 }
   0xd   : > { %p216_p10 = scmp.lt.s32.totalorder (!%p190_p9), %s1959_s22, 1  ;;  %s1905_s14 = smov (!%p190_p9), 120  }
   0xe   : > { %193 = sbr.rel (%p190_p9) target bundleno = 1263 (0x4ef), region = 40  ;;  %s1906_s25 = smov (!%p190_p9), 112  }
   0xf   : > { %s213_s12 = sand.u32 (!%p190_p9), 1, %s1893_s19   ;;  %s1631_s16 = sshll.u32 (!%p190_p9), %s1959_s22, 7 }
  0x10   : > { %s1538_s30 = scalar_lea.hbm (!%p190_p9), %s2217_s5, %s1631_s16  ;;  %s1527_s6 = scalar_lea.sflag (!%p190_p9), [#allocation3], %s213_s12 }
  0x11   : > { %s1907_s8 = smov (!%p190_p9), [#allocation2]  }
  0x13   : > { %v224_v0 = vld [vmem:[%s2213_s1 + $0x18] sm:$0xff]  ;;  %v1903_v2 = vmov 0.0   ;;  %v223_v3 = vld [vmem:[%s2213_s1 + $0x10] sm:$0xff]  ;;  %s217_s13 = scalar_select %p216_p10, %s1959_s22, 1  ;;  %v222_v5 = vld [vmem:[%s2213_s1 + $0x8] sm:$0xff]  ;;  %vm1904_vm0 = vmmov 0  }
  0x14   : > { %v228_v1 = vld [vmem:[%s2213_s1 + $0x38] sm:$0xff]  ;;  %1678 = vmatprep.subr.mxu0 %v1903_v2  ;;  %1689 = vmatprep.subr.mxu1 %v1903_v2  ;;  %v227_v4 = vld [vmem:[%s2213_s1 + $0x30] sm:$0xff]  ;;  %v226_v6 = vld [vmem:[%s2213_s1 + $0x28] sm:$0xff]  ;;  %vm265_vm1 = vcmask 261120   ;;  %vm556_vm2 = vcmask 64512   ;;  %s1845_s22 = sshll.u32 %s1907_s8, 4  ;;  %s1846_s22 = int_to_ptr.vmem [resolvable:$false] %s1845_s22 }
  0x15   : > { %1679 = vmatpush3.msra.mxu0 %v224_v0  ;;  %1690 = vmatpush3.msra.mxu1 %v228_v1  ;;  %s1604_s23 = sshll.u32 %s217_s13, 3  ;;  %v221_v7 = vld [vmem:[%s2213_s1] sm:$0xff]  ;;  %v232_v10 = vld [vmem:[%s2213_s1 + $0x58] sm:$0xff]  ;;  %v231_v11 = vld [vmem:[%s2213_s1 + $0x50] sm:$0xff]  ;;  %s1603_s13 = sshll.u32 %s213_s12, 3 }
  0x16   : > { %1680 = vmatprep.subr.mxu0 %v1903_v2  ;;  %1691 = vmatprep.subr.mxu1 %v1903_v2  ;;  %s219_s7 = scalar_lea.vmem %s2212_s0, %s1604_s23  ;;  %v225_v9 = vld [vmem:[%s2213_s1 + $0x20] sm:$0xff]  ;;  %v236_v12 = vld [vmem:[%s2213_s1 + $0x78] sm:$0xff]  ;;  %v230_v13 = vld [vmem:[%s2213_s1 + $0x48] sm:$0xff]  ;;  %s215_s17 = scalar_lea.vmem [#allocation2], %s1603_s13 }
  0x17   : > { %1681 = vmatpush3.msra.mxu0 %v223_v3  ;;  %1692 = vmatpush3.msra.mxu1 %v227_v4  ;;  %v220_v8 = vld [vmem:[%s219_s7] sm:$0xff]  ;;  %v235_v14 = vld [vmem:[%s2213_s1 + $0x70] sm:$0xff]  ;;  %v234_v16 = vld [vmem:[%s2213_s1 + $0x68] sm:$0xff]  ;;  %s1540_s23 = sshll.u32 %s215_s17, 4  ;;  %s1847_s9 = scalar_lea.vmem %s1846_s22, 256  ;;  %s1541_s23 = int_to_ptr.vmem [resolvable:$true] %s1540_s23 }
  0x18   : > { %1682 = vmatprep.subr.mxu0 %v1903_v2  ;;  %1693 = vmatprep.subr.mxu1 %v1903_v2  ;;  %v229_v15 = vld [vmem:[%s2213_s1 + $0x40] sm:$0xff]  ;;  %s1841_s7 = scalar_lea.vmem %s1541_s23, 128  ;;  %p1848_p0 = scmp.lt.s32.totalorder %s1541_s23, %s1846_s22 }
  0x19   : > { %1683 = vmatpush3.msra.mxu0 %v222_v5  ;;  %1686 = vmatprep.mubr.msk.f32.mxu0 %vm1904_vm0, %v1903_v2  ;;  %v233_v17 = vld [vmem:[%s2213_s1 + $0x60] sm:$0xff]  ;;  %p1842_p11 = scmp.ne.s32.totalorder %s1541_s23, %s1841_s7  ;;  %p1849_p1 = scmp.lt.s32.totalorder %s1847_s9, %s1841_s7 }
  0x1a   : > { %1684 = vmatprep.subr.mxu0 %v1903_v2  ;;  %1694 = vmatpush3.msra.mxu1 %v226_v6  ;;  %v1605_v18 = vld [vmem:[%s2214_s2] ss:$0 sm:$0xff]  ;;  %v1606_v21 = vld [vmem:[%s2214_s2 + $0x1] ss:$0 sm:$0xff]  ;;  %v1607_v26 = vld [vmem:[%s2214_s2 + $0x2] ss:$0 sm:$0xff] }
  0x1b   : > { %1685 = vmatpush3.msra.mxu0 %v221_v7  ;;  %1695 = vmatprep.subr.mxu1 %v1903_v2  ;;  %v1608_v29 = vld [vmem:[%s2214_s2 + $0x3] ss:$0 sm:$0xff]  ;;  %p1843_p12 = pnand %p1842_p11, %p1976_p5  ;;  %p1850_p2 = por %p1849_p1, %p1848_p0 }
  0x1c   : > { %1687 = vmatmul.mubr.msk.f32.vlgmr.msra.gmra.mxu0 %vm265_vm1, %v220_v8  ;;  %1700 = vmatprep.subr.mxu0 %v1903_v2 }
  0x1d   : > { %1696 = vmatpush3.msra.mxu1 %v225_v9  ;;  %1701 = vmatpush3.msra.mxu0 %v232_v10  ;;  %p1844_p13 = pneg %p1843_p12 }
  0x1e   : > { %1697 = vmatprep.mubr.msk.f32.mxu1 %vm1904_vm0, %v1903_v2  ;;  %1702 = vmatprep.subr.mxu0 %v1903_v2 }
  0x1f   : > { %1711 = vmatprep.subr.mxu1 %v1903_v2  ;;  %1698 = vmatmul.mubr.msk.f32.vlgmr.msra.gmra.mxu1 %vm265_vm1, %v220_v8  ;;  %p1851_p3 = pnand %p1850_p2, %p1844_p13 }
  0x20   : > { %1703 = vmatpush3.msra.mxu0 %v231_v11  ;;  %1712 = vmatpush3.msra.mxu1 %v236_v12 }
  0x21   : > { %1704 = vmatprep.subr.mxu0 %v1903_v2  ;;  %1713 = vmatprep.subr.mxu1 %v1903_v2 }
  0x22   : > { %1705 = vmatpush3.msra.mxu0 %v230_v13  ;;  %1714 = vmatpush3.msra.mxu1 %v235_v14 }
  0x23   : > { %1706 = vmatprep.subr.mxu0 %v1903_v2  ;;  %1715 = vmatprep.subr.mxu1 %v1903_v2 }
  0x24   : > { %1707 = vmatpush3.msra.mxu0 %v229_v15  ;;  %1708 = vmatprep.mubr.msk.f32.mxu0 %vm1904_vm0, %v1903_v2 }
  0x25   : > { %1716 = vmatpush3.msra.mxu1 %v234_v16  ;;  %1709 = vmatmul.mubr.msk.f32.vlgmr.msra.gmra.mxu0 %vm265_vm1, %v220_v8 }
  0x26   : > { %1717 = vmatprep.subr.mxu1 %v1903_v2  ;;  %1719 = vmatprep.mubr.msk.f32.mxu1 %vm1904_vm0, %v1903_v2 }
  0x27   : > { %1718 = vmatpush3.msra.mxu1 %v233_v17  ;;  %1722 = vmatprep.subr.mxu0 %v1903_v2 }
  0x28   : > { %1720 = vmatmul.mubr.msk.f32.vlgmr.msra.gmra.mxu1 %vm265_vm1, %v220_v8  ;;  %1724 = vmatprep.mubr.msk.f32.mxu0 %vm1904_vm0, %v1903_v2 }
  0x29   : > { %1727 = vmatprep.subr.mxu1 %v1903_v2  ;;  %1729 = vmatprep.mubr.msk.f32.mxu1 %vm1904_vm0, %v1903_v2 }
  0xdc   : > { %v335_v19 = vpop.f32.mrf.mxu0 }
  0xdd   : > { %v336_v20 = vadd.f32 %v1605_v18, %v335_v19 }
  0xde   : > { %v1688_v22 = vpop.f32.mrf.mxu0 }
  0xdf   : > { %v405_v23 = vpop.f32.mrf.mxu1  ;;  %554 = vrot.lane.b32.xlu0 %v336_v20, %s1905_s14  ;;  %v549_v35 = vmul.f32 0.35355338, %v336_v20 }
  0xe0   : > { %v2079_v24 = vadd.f32 %v1606_v21, %v405_v23 }
  0xe1   : > { %v1699_v25 = vpop.f32.mrf.mxu1 }
  0xe2   : > { %v550_v37 = vmul.f32 0.35355338, %v2079_v24 }
  0xe3   : > { %633 = vrot.lane.b32.xlu0 %v2079_v24, %s1905_s14 }
  0xe5   : > { %v475_v27 = vpop.f32.mrf.mxu0 }
  0xe6   : > { %v2085_v28 = vadd.f32 %v1607_v26, %v475_v27  ;;  %v1214_v27 = vld [vmem:[%s2215_s3] sm:$0xff] }
  0xe7   : > { %v1710_v30 = vpop.f32.mrf.mxu0 }
  0xe8   : > { %v545_v31 = vpop.f32.mrf.mxu1  ;;  %711 = vrot.lane.b32.xlu1 %v2085_v28, %s1905_s14  ;;  %v551_v39 = vmul.f32 0.35355338, %v2085_v28 }
  0xe9   : > { %v2091_v32 = vadd.f32 %v1608_v29, %v545_v31  ;;  %v1216_v29 = vld [vmem:[%s2215_s3 + $0x10] sm:$0xff] }
  0xea   : > { %v1721_v33 = vpop.f32.mrf.mxu1 }
  0xeb   : > { %v552_v41 = vmul.f32 0.35355338, %v2091_v32 }
  0xec   : > { %789 = vrot.lane.b32.xlu1 %v2091_v32, %s1905_s14 }
 0x151   : > { %v555_v34 = vpop.permute.xlu0 %554 }
 0x152   : > { %1723 = vmatpush3.xpose.msk.msra.mxu0 %vm556_vm2, %v555_v34 }
 0x153   : > { %1732 = vmatprep.subr.mxu0 %v1903_v2 }
 0x155   : > { %v634_v36 = vpop.permute.xlu0 %633  ;;  %1725 = vmatmul.mubr.msk.f32.vlgmr.msra.gmra.mxu0 %vm556_vm2, %v549_v35 }
 0x156   : > { %1728 = vmatpush3.xpose.msk.msra.mxu1 %vm556_vm2, %v634_v36  ;;  %1734 = vmatprep.mubr.msk.f32.mxu0 %vm1904_vm0, %v1903_v2 }
 0x157   : > { %1737 = vmatprep.subr.mxu1 %v1903_v2 }
 0x159   : > { %1730 = vmatmul.mubr.msk.f32.vlgmr.msra.gmra.mxu1 %vm556_vm2, %v550_v37 }
 0x15a   : > { %v712_v38 = vpop.permute.xlu1 %711  ;;  %1739 = vmatprep.mubr.msk.f32.mxu1 %vm1904_vm0, %v1903_v2 }
 0x15b   : > { %1733 = vmatpush3.xpose.msk.msra.mxu0 %vm556_vm2, %v712_v38 }
 0x15c   : > { %1742 = vmatprep.subr.mxu0 %v1903_v2 }
 0x15e   : > { %v790_v40 = vpop.permute.xlu1 %789  ;;  %1735 = vmatmul.mubr.msk.f32.vlgmr.msra.gmra.mxu0 %vm556_vm2, %v551_v39 }
 0x15f   : > { %1738 = vmatpush3.xpose.msk.msra.mxu1 %vm556_vm2, %v790_v40  ;;  %1744 = vmatprep.mubr.msk.f32.mxu0 %vm1904_vm0, %v1903_v2 }
 0x160   : > { %1747 = vmatprep.subr.mxu1 %v1903_v2 }
 0x162   : > { %1740 = vmatmul.mubr.msk.f32.vlgmr.msra.gmra.mxu1 %vm556_vm2, %v552_v41 }
 0x163   : > { %1749 = vmatprep.mubr.msk.f32.mxu1 %vm1904_vm0, %v1903_v2 }
 0x215   : > { %v628_v42 = vpop.f32.mrf.mxu0 }
 0x216   : > { %v866_v43 = vsel %vm556_vm2, %v628_v42, -inf }
 0x217   : > { %867 = vmax.xlane.f32.xlu0 %v866_v43  ;;  %v1726_v44 = vpop.f32.mrf.mxu0 }
 0x219   : > { %v706_v45 = vpop.f32.mrf.mxu1 }
 0x21a   : > { %v869_v46 = vsel %vm556_vm2, %v706_v45, -inf }
 0x21b   : > { %v1731_v47 = vpop.f32.mrf.mxu1  ;;  %870 = vmax.xlane.f32.xlu1 %v869_v46 }
 0x21e   : > { %v784_v48 = vpop.f32.mrf.mxu0 }
 0x21f   : > { %v872_v49 = vsel %vm556_vm2, %v784_v48, -inf }
 0x220   : > { %873 = vmax.xlane.f32.xlu0 %v872_v49  ;;  %v1736_v50 = vpop.f32.mrf.mxu0 }
 0x222   : > { %v862_v51 = vpop.f32.mrf.mxu1 }
 0x223   : > { %v875_v52 = vsel %vm556_vm2, %v862_v51, -inf }
 0x224   : > { %v1741_v53 = vpop.f32.mrf.mxu1  ;;  %876 = vmax.xlane.f32.xlu0 %v875_v52 }
 0x22c   : > { %910 = vrot.lane.b32.xlu1 %v336_v20, %s1906_s25 }
 0x2a0   : > { %v868_v54 = vpop.xlane.xlu0 %867 }
 0x2a1   : > { %v878_v55 = vsub.f32 %v628_v42, %v868_v54 }
 0x2a3   : > { %v882_v56 = vmul.f32 1.442695, %v878_v55 }
 0x2a4   : > { %v871_v57 = vpop.xlane.xlu1 %870 }
 0x2a5   : > { %1825 = vpow2.f32 %v882_v56  ;;  %v879_v58 = vsub.f32 %v706_v45, %v871_v57 }
 0x2a7   : > { %v884_v59 = vmul.f32 1.442695, %v879_v58 }
 0x2a8   : > { %v911_v60 = vpop.permute.xlu1 %910 }
 0x2a9   : > { %1827 = vpow2.f32 %v884_v59  ;;  %v874_v61 = vpop.xlane.xlu0 %873  ;;  %1743 = vmatpush3.msra.mxu0 %v911_v60 }
 0x2aa   : > { %v880_v62 = vsub.f32 %v784_v48, %v874_v61  ;;  %1752 = vmatprep.subr.mxu0 %v1903_v2 }
 0x2ac   : > { %v886_v63 = vmul.f32 1.442695, %v880_v62 }
 0x2ad   : > { %v877_v0 = vpop.xlane.xlu0 %876 }
 0x2ae   : > { %1829 = vpow2.f32 %v886_v63  ;;  %v881_v1 = vsub.f32 %v862_v51, %v877_v0  ;;  %v1629_v51 = vld [vmem:[%s2216_s4] ss:$0 sm:$0xff] }
 0x2b0   : > { %v888_v3 = vmul.f32 1.442695, %v881_v1 }
 0x2b2   : > { %v1826_v4 = vpop.eup %1825  ;;  %1831 = vpow2.f32 %v888_v3 }
 0x2b3   : > { %v890_v5 = vsel %vm556_vm2, %v1826_v4, 0.0 }
 0x2b4   : > { %891 = vadd.xlane.f32.xlu1 %v890_v5 }
 0x2b6   : > { %v1828_v6 = vpop.eup %1827 }
 0x2b7   : > { %v893_v7 = vsel %vm556_vm2, %v1828_v6, 0.0 }
 0x2b8   : > { %894 = vadd.xlane.f32.xlu0 %v893_v7 }
 0x2bb   : > { %v1830_v8 = vpop.eup %1829 }
 0x2bc   : > { %v896_v9 = vsel %vm556_vm2, %v1830_v8, 0.0 }
 0x2bd   : > { %897 = vadd.xlane.f32.xlu1 %v896_v9 }
 0x2bf   : > { %v1832_v10 = vpop.eup %1831 }
 0x2c0   : > { %v899_v11 = vsel %vm556_vm2, %v1832_v10, 0.0 }
 0x2c1   : > { %900 = vadd.xlane.f32.xlu0 %v899_v11 }
 0x2ce   : > { %1062 = vrot.lane.b32.xlu1 %v2085_v28, %s1906_s25  ;;  %v1215_v28 = vld [vmem:[%s2215_s3 + $0x8] sm:$0xff] }
 0x2d2   : > { %1138 = vrot.lane.b32.xlu1 %v2091_v32, %s1906_s25  ;;  %v1217_v32 = vld [vmem:[%s2215_s3 + $0x18] sm:$0xff] }
 0x2d7   : > { %986 = vrot.lane.b32.xlu0 %v2079_v24, %s1906_s25 }
 0x33d   : > { %v892_v12 = vpop.xlane.xlu1 %891 }
 0x33e   : > { %1833 = vrcp.f32 %v892_v12 }
 0x341   : > { %v895_v13 = vpop.xlane.xlu0 %894 }
 0x342   : > { %1835 = vrcp.f32 %v895_v13 }
 0x346   : > { %v898_v14 = vpop.xlane.xlu1 %897 }
 0x347   : > { %1837 = vrcp.f32 %v898_v14 }
 0x34a   : > { %v901_v15 = vpop.xlane.xlu0 %900  ;;  %v1063_v17 = vpop.permute.xlu1 %1062 }
 0x34b   : > { %v1834_v16 = vpop.eup %1833  ;;  %1839 = vrcp.f32 %v901_v15 }
 0x34c   : > { %v906_v18 = vmul.f32 %v1834_v16, %v1826_v4 }
 0x34e   : > { %v987_v19 = vpop.permute.xlu0 %986  ;;  %1745 = vmatmul.mubr.msk.f32.vlgmr.msra.gmra.mxu0 %vm556_vm2, %v906_v18  ;;  %v1139_v22 = vpop.permute.xlu1 %1138 }
 0x34f   : > { %v1836_v20 = vpop.eup %1835  ;;  %1748 = vmatpush3.msra.mxu1 %v987_v19  ;;  %1753 = vmatpush3.msra.mxu0 %v1063_v17 }
 0x350   : > { %1757 = vmatprep.subr.mxu1 %v1903_v2  ;;  %v907_v21 = vmul.f32 %v1836_v20, %v1828_v6  ;;  %1754 = vmatprep.mubr.msk.f32.mxu0 %vm1904_vm0, %v1903_v2 }
 0x351   : > { %1762 = vmatprep.subr.mxu0 %v1903_v2 }
 0x352   : > { %1750 = vmatmul.mubr.msk.f32.vlgmr.msra.gmra.mxu1 %vm556_vm2, %v907_v21 }
 0x353   : > { %1758 = vmatpush3.msra.mxu1 %v1139_v22  ;;  %1759 = vmatprep.mubr.msk.f32.mxu1 %vm1904_vm0, %v1903_v2 }
 0x354   : > { %v1838_v23 = vpop.eup %1837  ;;  %1767 = vmatprep.subr.mxu1 %v1903_v2 }
 0x355   : > { %v908_v24 = vmul.f32 %v1838_v23, %v1830_v8 }
 0x357   : > { %1755 = vmatmul.mubr.msk.f32.vlgmr.msra.gmra.mxu0 %vm556_vm2, %v908_v24 }
 0x358   : > { %v1840_v25 = vpop.eup %1839  ;;  %1764 = vmatprep.mubr.msk.f32.mxu0 %vm1904_vm0, %v1903_v2  ;;  %1763 = vmatpush3.msra.mxu0 %v1214_v27 }
 0x359   : > { %v909_v26 = vmul.f32 %v1840_v25, %v1832_v10  ;;  %1772 = vmatprep.subr.mxu0 %v1903_v2 }
 0x35b   : > { %1760 = vmatmul.mubr.msk.f32.vlgmr.msra.gmra.mxu1 %vm556_vm2, %v909_v26 }
 0x35c   : > { %1769 = vmatprep.mubr.msk.f32.mxu1 %vm1904_vm0, %v1903_v2  ;;  %1768 = vmatpush3.msra.mxu1 %v1215_v28 }
 0x35d   : > { %1777 = vmatprep.subr.mxu1 %v1903_v2 }
 0x40e   : > { %v982_v30 = vpop.f32.mrf.mxu0 }
 0x40f   : > { %1765 = vmatmul.mubr.msk.f32.vlgmr.msra.gmra.mxu0 %vm556_vm2, %v982_v30 }
 0x410   : > { %v1746_v31 = vpop.f32.mrf.mxu0  ;;  %1773 = vmatpush3.msra.mxu0 %v1216_v29  ;;  %1774 = vmatprep.mubr.msk.f32.mxu0 %vm1904_vm0, %v1903_v2 }
 0x412   : > { %v1058_v33 = vpop.f32.mrf.mxu1 }
 0x413   : > { %1770 = vmatmul.mubr.msk.f32.vlgmr.msra.gmra.mxu1 %vm556_vm2, %v1058_v33 }
 0x414   : > { %v1751_v34 = vpop.f32.mrf.mxu1  ;;  %1778 = vmatpush3.msra.mxu1 %v1217_v32  ;;  %1779 = vmatprep.mubr.msk.f32.mxu1 %vm1904_vm0, %v1903_v2 }
 0x417   : > { %v1134_v35 = vpop.f32.mrf.mxu0 }
 0x418   : > { %1775 = vmatmul.mubr.msk.f32.vlgmr.msra.gmra.mxu0 %vm556_vm2, %v1134_v35 }
 0x419   : > { %v1756_v36 = vpop.f32.mrf.mxu0 }
 0x41b   : > { %v1210_v37 = vpop.f32.mrf.mxu1 }
 0x41c   : > { %1780 = vmatmul.mubr.msk.f32.vlgmr.msra.gmra.mxu1 %vm556_vm2, %v1210_v37 }
 0x41d   : > { %v1761_v38 = vpop.f32.mrf.mxu1 }
 0x4cf   : > { %v1287_v39 = vpop.f32.mrf.mxu0 }
 0x4d0   : > { %v1510_v2 = vsel %vm265_vm1, %v1287_v39, 0.0 }
 0x4d1   : > { %v1766_v40 = vpop.f32.mrf.mxu0 }
 0x4d3   : > { %v1360_v41 = vpop.f32.mrf.mxu1 }
 0x4d4   : > { %v1511_v43 = vsel %vm265_vm1, %v1360_v41, 0.0 }
 0x4d5   : > { %v1771_v42 = vpop.f32.mrf.mxu1  ;;  %v1512_v46 = vadd.f32 %v1511_v43, %v1510_v2 }
 0x4d8   : > { %v1433_v44 = vpop.f32.mrf.mxu0 }
 0x4d9   : > { %v1513_v45 = vsel %vm265_vm1, %v1433_v44, 0.0 }
 0x4da   : > { %v1776_v47 = vpop.f32.mrf.mxu0  ;;  %v1514_v48 = vadd.f32 %v1513_v45, %v1512_v46 }
 0x4dc   : > { %v1506_v49 = vpop.f32.mrf.mxu1 }
 0x4dd   : > { %v1515_v50 = vsel %vm265_vm1, %v1506_v49, 0.0 }
 0x4de   : > { %v1516_v52 = vadd.f32 %v1515_v50, %v1514_v48  ;;  %v1781_v53 = vpop.f32.mrf.mxu1 }
 0x4e0   : > { %v1524_v54 = vadd.f32 %v1629_v51, %v1516_v52 }
 0x4e2   : > { %1525 = vst.msk [vmem:[%s215_s17] sm:$0xff] %vm265_vm1, %v1524_v54 }
 0x4e3   : > { %1854 = shalt.err (!%p1851_p3)
}
 0x4e4   : > { %s1855_s10 = scalar_lea.hbm %s1538_s30, 128  ;;  %s1859_s13 = scalar_lea.hbm %s2217_s5, 256 }
 0x4e5   : > { %p1856_p4 = scmp.ne.s32.totalorder %s1538_s30, %s1855_s10  ;;  %p1860_p9 = scmp.lt.s32.totalorder %s1538_s30, %s2217_s5 }
 0x4e6   : > { %p1861_p10 = scmp.lt.s32.totalorder %s1859_s13, %s1855_s10 }
 0x4e7   : > { %p1857_p7 = pnand %p1856_p4, %p1976_p5 }
 0x4e8   : > { %p1862_p11 = por %p1861_p10, %p1860_p9 }
 0x4e9   : > { %p1858_p8 = pneg %p1857_p7 }
 0x4eb   : > { %p1863_p12 = pnand %p1862_p11, %p1858_p8 }
 0x4ed   : > { %1866 = shalt.err (!%p1863_p12)
}
 0x4ee   : > { %1782 = dma.vmem_to_hbm [thread:$0]  (%p1976_p5), %s1541_s23, 128, %s1538_s30, %s1527_s6  }
 0x4ef PF: > { %p1788_p13 = scmp.ge.s32.totalorder %s1901_s21, 2  ;;  %s1552_s16 = sand.u32 1, %s1889_s18  }
 0x4f0   : > { %s1553_s17 = scalar_lea.sflag [#allocation3], %s1552_s16 }
 0x4f1   : > { %p1785_p0 = pnand %p1788_p13, %p1980_p6 }
 0x4f3   : > { %p1786_p1 = pneg %p1785_p0 }
 0x4f5   : > { %1884 = dma.done.wait (%p1786_p1), %s1553_s17, 128  }
 0x4f6   : > { %1886 = vsyncadd (%p1786_p1), %s1553_s17, 4294967168  ;;  %p15_p2 = scmp.ge.s32.totalorder %s1963_s24, 4   ;;  %s2220_s18 = smov %s1893_s19 }
 0x4f7   : > { %s2221_s19 = smov %s1897_s20  ;;  %s2222_s20 = smov %s1974_s27 }
 0x4f8   : > { %s2223_s21 = smov %s1963_s24  ;;  %17 = sbr.rel (!%p15_p2) target bundleno = 3 (0x3), region = 75 }
 0x4fd   :  { %1558 = vsyncpa [#allocation3], 1 }
 0x4fe   :  { %1560 = vsyncpa [#allocation3 + $0x1], 1 }

</bundles_post_ra>
